<compile_context>
chip_gen: v7x
topology: tpu7x:2x2x1
jax: 0.10.0
libtpu: 0.0.40
codegen_flags: <defaults>
</compile_context>

<pallas_src>
import jax
import jax.numpy as jnp
from jax.experimental import pallas as pl
from jax.experimental.pallas import tpu as pltpu


def _elu(x):
    # ELU with alpha=1.0 (matches F.elu default), computed in f32 on the VPU/EUP.
    return jnp.where(x > 0, x, jnp.exp(jnp.minimum(x, 0.0)) - 1.0)


def fnetwork_kernel(xt_ref, w1_ref, b1_ref, w2_ref, b2_ref, w3_ref, b3_ref, o_ref):
    xt = xt_ref[...].astype(jnp.float32)               # (x_dim, tile_b), batch on lanes

    # fc1 + ELU:  (h, x_dim) @ (x_dim, tile_b) -> (h, tile_b)
    h = jnp.dot(w1_ref[...], xt, preferred_element_type=jnp.float32) + b1_ref[...]
    h = _elu(h)

    # fc2 + ELU:  (h, h) @ (h, tile_b) -> (h, tile_b)
    h = jnp.dot(w2_ref[...], h, preferred_element_type=jnp.float32) + b2_ref[...]
    h = _elu(h)

    # fc3 + sigmoid: VPU multiply + sublane reduction (no N=1 matmul on the MXU).
    logit = jnp.sum(h * w3_ref[...], axis=0, keepdims=True) + b3_ref[0]   # (1, tile_b)
    o_ref[...] = (1.0 / (1.0 + jnp.exp(-logit))).astype(o_ref.dtype)


def fnetwork_forward(x, params, *, tile_b=512):
    """Runs the fused MLP kernel, tiling the batch along the lane axis."""
    w1, b1, w2, b2, w3, b3 = params
    B, x_dim = x.shape
    h_dim = w1.shape[0]

    # Pick a lane-aligned batch tile and pad the batch up to a multiple of it.
    tile_b = max(128, (min(tile_b, 512) // 128) * 128)
    b_pad = pl.cdiv(B, tile_b) * tile_b
    # Keep >= 2 grid steps when possible so both v7x TensorCores get work.
    if b_pad // tile_b < 2 and (b_pad // 2) % 128 == 0:
        tile_b = b_pad // 2
    grid = (b_pad // tile_b,)

    xt = x.T  # (x_dim, B): batch on the 128-lane axis (cheap XLA layout plumbing)
    if b_pad != B:
        xt = jnp.pad(xt, ((0, 0), (0, b_pad - B)))

    const = lambda shape: pl.BlockSpec(shape, lambda i: (0, 0))  # tiny weights, resident

    out = pl.pallas_call(
        fnetwork_kernel,
        out_shape=jax.ShapeDtypeStruct((1, b_pad), jnp.float32),
        grid_spec=pltpu.PrefetchScalarGridSpec(
            num_scalar_prefetch=0,
            grid=grid,
            in_specs=[
                pl.BlockSpec((x_dim, tile_b), lambda i: (0, i)),    # x^T batch tile
                const((h_dim, x_dim)),                              # W1 (PyTorch layout)
                const((h_dim, 1)),                                  # b1 (column)
                const((h_dim, h_dim)),                              # W2
                const((h_dim, 1)),                                  # b2 (column)
                const((h_dim, 1)),                                  # w3 (fc3.weight^T)
                pl.BlockSpec(memory_space=pltpu.MemorySpace.SMEM),  # b3 scalar in SMEM
            ],
            out_specs=pl.BlockSpec((1, tile_b), lambda i: (0, i)),  # lane-dense output
        ),
        compiler_params=pltpu.CompilerParams(
            dimension_semantics=("parallel",),
        ),
    )(xt, w1, b1, w2, b2, w3, b3)

    return out[:, :B].reshape(B, 1)


def init_params(key, x_dim, h_dim=32):
    """PyTorch-style uniform(-1/sqrt(fan_in), 1/sqrt(fan_in)) init.

    Weights are in PyTorch nn.Linear layout (out_features, in_features);
    biases are stored as (out_features, 1) columns; b3 is a (1,) scalar."""
    ks = jax.random.split(key, 6)

    def uniform(k, shape, fan_in):
        bound = 1.0 / jnp.sqrt(jnp.float32(fan_in))
        return jax.random.uniform(k, shape, jnp.float32, -bound, bound)

    w1 = uniform(ks[0], (h_dim, x_dim), x_dim)
    b1 = uniform(ks[1], (h_dim, 1), x_dim)
    w2 = uniform(ks[2], (h_dim, h_dim), h_dim)
    b2 = uniform(ks[3], (h_dim, 1), h_dim)
    w3 = uniform(ks[4], (h_dim, 1), h_dim)   # fc3.weight is (1, h); stored transposed
    b3 = uniform(ks[5], (1,), h_dim)
    return (w1, b1, w2, b2, w3, b3)


def fnetwork_reference(x, params):
    w1, b1, w2, b2, w3, b3 = params
    h = jax.nn.elu(x @ w1.T + b1[:, 0])
    h = jax.nn.elu(h @ w2.T + b2[:, 0])
    return jax.nn.sigmoid(h @ w3 + b3)


if __name__ == "__main__":
    key = jax.random.PRNGKey(0)
    k_x, k_p = jax.random.split(key)

    # x_dim=16, h_dim=32 as the module implies; B=512 -> 2 batch tiles of 256.
    B, X_DIM, H_DIM = 512, 16, 32
    x = jax.random.normal(k_x, (B, X_DIM), jnp.float32)
    params = init_params(k_p, X_DIM, H_DIM)

    out = jax.block_until_ready(fnetwork_forward(x, params))

    ref = fnetwork_reference(x, params)
    assert out.shape == (B, 1)
    assert jnp.allclose(out, ref, atol=1e-5, rtol=1e-5), "mismatch vs reference"

    print("KERNEL_OK")
</pallas_src>

<mosaic_0001>
module attributes {stable_mosaic.version = 11 : i64} {
  func.func @fnetwork_kernel(%arg0: i32, %arg1: memref<16x256xf32, #tpu.memory_space<vmem>>, %arg2: memref<32x16xf32, #tpu.memory_space<vmem>>, %arg3: memref<32x1xf32, #tpu.memory_space<vmem>>, %arg4: memref<32x32xf32, #tpu.memory_space<vmem>>, %arg5: memref<32x1xf32, #tpu.memory_space<vmem>>, %arg6: memref<32x1xf32, #tpu.memory_space<vmem>>, %arg7: memref<1xf32, #tpu.memory_space<smem>>, %arg8: memref<1x256xf32, #tpu.memory_space<vmem>>) attributes {dimension_semantics = [#tpu.dimension_semantics<parallel>], iteration_bounds = array<i64: 2>, scalar_prefetch = 0 : i64, scratch_operands = 0 : i64, tpu.core_type = #tpu.core_type<tc>, window_params = [{transform_indices = @transform_0, window_bounds = array<i64: 16, 256>}, {pipeline_mode = #tpu.pipeline_mode<synchronous>, transform_indices = @transform_1, window_bounds = array<i64: 32, 16>}, {pipeline_mode = #tpu.pipeline_mode<synchronous>, transform_indices = @transform_2, window_bounds = array<i64: 32, 1>}, {pipeline_mode = #tpu.pipeline_mode<synchronous>, transform_indices = @transform_3, window_bounds = array<i64: 32, 32>}, {pipeline_mode = #tpu.pipeline_mode<synchronous>, transform_indices = @transform_4, window_bounds = array<i64: 32, 1>}, {pipeline_mode = #tpu.pipeline_mode<synchronous>, transform_indices = @transform_5, window_bounds = array<i64: 32, 1>}, {transform_indices = @transform_6, window_bounds = array<i64: 1>}, {transform_indices = @transform_7, window_bounds = array<i64: 1, 256>}]} {
    %c0 = arith.constant 0 : index
    %c0_0 = arith.constant 0 : index
    %0 = vector.load %arg1[%c0, %c0_0] : memref<16x256xf32, #tpu.memory_space<vmem>>, vector<16x256xf32>
    %c0_1 = arith.constant 0 : index
    %c0_2 = arith.constant 0 : index
    %1 = vector.load %arg2[%c0_1, %c0_2] : memref<32x16xf32, #tpu.memory_space<vmem>>, vector<32x16xf32>
    %cst = arith.constant dense<0.000000e+00> : vector<32x256xf32>
    %2 = tpu.matmul %1, %0, %cst {dimension_numbers = #tpu.dot_dimension_numbers<[1], [0], [0], [1], [0, 0, 1, 1], [], []>} : vector<32x16xf32>, vector<16x256xf32>, vector<32x256xf32> -> vector<32x256xf32>
    %c0_3 = arith.constant 0 : index
    %c0_4 = arith.constant 0 : index
    %3 = vector.load %arg3[%c0_3, %c0_4] : memref<32x1xf32, #tpu.memory_space<vmem>>, vector<32x1xf32>
    %4 = vector.broadcast %3 : vector<32x1xf32> to vector<32x256xf32>
    %5 = arith.addf %2, %4 : vector<32x256xf32>
    %cst_5 = arith.constant 0.000000e+00 : f32
    %6 = vector.broadcast %cst_5 : f32 to vector<32x256xf32>
    %7 = arith.cmpf ogt, %5, %6 : vector<32x256xf32>
    %cst_6 = arith.constant 0.000000e+00 : f32
    %8 = vector.broadcast %cst_6 : f32 to vector<32x256xf32>
    %9 = arith.minimumf %5, %8 : vector<32x256xf32>
    %10 = math.exp %9 : vector<32x256xf32>
    %cst_7 = arith.constant 1.000000e+00 : f32
    %11 = vector.broadcast %cst_7 : f32 to vector<32x256xf32>
    %12 = arith.subf %10, %11 : vector<32x256xf32>
    %13 = arith.select %7, %5, %12 : vector<32x256xi1>, vector<32x256xf32>
    %c0_8 = arith.constant 0 : index
    %c0_9 = arith.constant 0 : index
    %14 = vector.load %arg4[%c0_8, %c0_9] : memref<32x32xf32, #tpu.memory_space<vmem>>, vector<32x32xf32>
    %cst_10 = arith.constant dense<0.000000e+00> : vector<32x256xf32>
    %15 = tpu.matmul %14, %13, %cst_10 {dimension_numbers = #tpu.dot_dimension_numbers<[1], [0], [0], [1], [0, 0, 1, 1], [], []>} : vector<32x32xf32>, vector<32x256xf32>, vector<32x256xf32> -> vector<32x256xf32>
    %c0_11 = arith.constant 0 : index
    %c0_12 = arith.constant 0 : index
    %16 = vector.load %arg5[%c0_11, %c0_12] : memref<32x1xf32, #tpu.memory_space<vmem>>, vector<32x1xf32>
    %17 = vector.broadcast %16 : vector<32x1xf32> to vector<32x256xf32>
    %18 = arith.addf %15, %17 : vector<32x256xf32>
    %cst_13 = arith.constant 0.000000e+00 : f32
    %19 = vector.broadcast %cst_13 : f32 to vector<32x256xf32>
    %20 = arith.cmpf ogt, %18, %19 : vector<32x256xf32>
    %cst_14 = arith.constant 0.000000e+00 : f32
    %21 = vector.broadcast %cst_14 : f32 to vector<32x256xf32>
    %22 = arith.minimumf %18, %21 : vector<32x256xf32>
    %23 = math.exp %22 : vector<32x256xf32>
    %cst_15 = arith.constant 1.000000e+00 : f32
    %24 = vector.broadcast %cst_15 : f32 to vector<32x256xf32>
    %25 = arith.subf %23, %24 : vector<32x256xf32>
    %26 = arith.select %20, %18, %25 : vector<32x256xi1>, vector<32x256xf32>
    %c0_16 = arith.constant 0 : index
    %c0_17 = arith.constant 0 : index
    %27 = vector.load %arg6[%c0_16, %c0_17] : memref<32x1xf32, #tpu.memory_space<vmem>>, vector<32x1xf32>
    %28 = vector.broadcast %27 : vector<32x1xf32> to vector<32x256xf32>
    %29 = arith.mulf %26, %28 : vector<32x256xf32>
    %cst_18 = arith.constant dense<0.000000e+00> : vector<256xf32>
    %30 = vector.multi_reduction <add>, %29, %cst_18 [0] : vector<32x256xf32> to vector<256xf32>
    %31 = vector.shape_cast %30 : vector<256xf32> to vector<1x256xf32>
    %c0_19 = arith.constant 0 : index
    %32 = memref.load %arg7[%c0_19] : memref<1xf32, #tpu.memory_space<smem>>
    %33 = vector.broadcast %32 : f32 to vector<1x256xf32>
    %34 = arith.addf %31, %33 : vector<1x256xf32>
    %cst_20 = arith.constant 0.000000e+00 : f32
    %35 = vector.broadcast %cst_20 : f32 to vector<1x256xf32>
    %36 = arith.subf %35, %34 : vector<1x256xf32>
    %37 = math.exp %36 : vector<1x256xf32>
    %cst_21 = arith.constant 1.000000e+00 : f32
    %38 = vector.broadcast %cst_21 : f32 to vector<1x256xf32>
    %39 = arith.addf %38, %37 : vector<1x256xf32>
    %cst_22 = arith.constant 1.000000e+00 : f32
    %40 = vector.broadcast %cst_22 : f32 to vector<1x256xf32>
    %41 = arith.divf %40, %39 : vector<1x256xf32>
    %c0_23 = arith.constant 0 : index
    %c0_24 = arith.constant 0 : index
    %42 = vector.load %arg8[%c0_23, %c0_24] : memref<1x256xf32, #tpu.memory_space<vmem>>, vector<1x256xf32>
    tpu.vector_store %arg8[%c0_23, %c0_24], %41 {strides = array<i32>} : memref<1x256xf32, #tpu.memory_space<vmem>>, vector<1x256xf32>,
    return
  }
  func.func @transform_0(%arg0: i32) -> (i32, i32) {
    %c0_i32 = arith.constant 0 : i32
    %c0_i32_0 = arith.constant 0 : i32
    return %c0_i32, %arg0 : i32, i32
  }
  func.func @transform_1(%arg0: i32) -> (i32, i32) {
    %c0_i32 = arith.constant 0 : i32
    %c0_i32_0 = arith.constant 0 : i32
    %c0_i32_1 = arith.constant 0 : i32
    return %c0_i32, %c0_i32_0 : i32, i32
  }
  func.func @transform_2(%arg0: i32) -> (i32, i32) {
    %c0_i32 = arith.constant 0 : i32
    %c0_i32_0 = arith.constant 0 : i32
    %c0_i32_1 = arith.constant 0 : i32
    return %c0_i32, %c0_i32_0 : i32, i32
  }
  func.func @transform_3(%arg0: i32) -> (i32, i32) {
    %c0_i32 = arith.constant 0 : i32
    %c0_i32_0 = arith.constant 0 : i32
    %c0_i32_1 = arith.constant 0 : i32
    return %c0_i32, %c0_i32_0 : i32, i32
  }
  func.func @transform_4(%arg0: i32) -> (i32, i32) {
    %c0_i32 = arith.constant 0 : i32
    %c0_i32_0 = arith.constant 0 : i32
    %c0_i32_1 = arith.constant 0 : i32
    return %c0_i32, %c0_i32_0 : i32, i32
  }
  func.func @transform_5(%arg0: i32) -> (i32, i32) {
    %c0_i32 = arith.constant 0 : i32
    %c0_i32_0 = arith.constant 0 : i32
    %c0_i32_1 = arith.constant 0 : i32
    return %c0_i32, %c0_i32_0 : i32, i32
  }
  func.func @transform_6(%arg0: i32) -> i32 {
    %c0_i32 = arith.constant 0 : i32
    %c0_i32_0 = arith.constant 0 : i32
    return %c0_i32 : i32
  }
  func.func @transform_7(%arg0: i32) -> (i32, i32) {
    %c0_i32 = arith.constant 0 : i32
    %c0_i32_0 = arith.constant 0 : i32
    return %c0_i32, %arg0 : i32, i32
  }
}

</mosaic_0001>

<bundles_post_ra>
// kernel: tpu_custom_call.1
= control target key start
LH: loop header
LB: loop body
LE: loop exit
PB: predicated region body
PF: predicated region fallthrough
CT: control target
= control target key end

     0   :  { %s1264_s0 = inlined_call_operand.vmem [shape: f32[16,512], index: 0, kind: input, shape index: {}]   ;;  %s1265_s1 = inlined_call_operand.vmem [shape: f32[32,16], index: 1, kind: input, shape index: {}]   ;;  %s1266_s2 = inlined_call_operand.vmem [shape: f32[32,1], index: 2, kind: input, shape index: {}]   ;;  %s1267_s3 = inlined_call_operand.vmem [shape: f32[32,32], index: 3, kind: input, shape index: {}]   ;;  %s1268_s4 = inlined_call_operand.vmem [shape: f32[32,1], index: 4, kind: input, shape index: {}]   ;;  %s1269_s5 = inlined_call_operand.vmem [shape: f32[32,1], index: 5, kind: input, shape index: {}]   ;;  %s1270_s6 = inlined_call_operand.<no memory space> [shape: f32[1], index: 6, kind: input, shape index: {}]   ;;  %s1271_s7 = inlined_call_operand.hbm [shape: f32[1,512], index: 7, kind: output, shape index: {}]  }
   0x1   :  { %12 = sst [smem:[#allocation2]] %s1270_s6 }
   0x2   :  { %13 = vsyncpa [#allocation5], 0 }
   0x3   :  { %15 = vsyncpa [#allocation5 + $0x1], 0  ;;  %s1082_s26 = smov 0   ;;  %s1084_s27 = smov 0  }
   0x4   :  { %s1086_s28 = smov 0   ;;  %s1088_s29 = smov 0  }
   0x5 LB: > { %s834_s6 = sadd.s32 4294967295, %s1033_s29   ;;  %s835_s30 = sadd.s32 4294967294, %s1033_s29   ;;  %s1033_s29 = sphi %s1088_s29, %s1277_s29   ;;  %s1029_s28 = sphi %s1086_s28, %s1276_s28   ;;  %s1025_s27 = sphi %s1084_s27, %s1275_s27   ;;  %s1021_s26 = sphi %s1082_s26, %s1274_s26  }
   0x6   : > { %s1105_s8 = sadd.s32 1, %s1033_s29   ;;  %s28_s9 = sadd.s32 1, %s1029_s28 }
   0x7   : > { %s25_s10 = ssub.s32 %s1033_s29, %s1105_s8  ;;  %p35_p0 = scmp.ne.s32.totalorder %s1029_s28, %s1025_s27 }
   0x8   : > { %p26_p1 = scmp.eq.s32.totalorder %s25_s10, 0  ;;  %p36_p2 = scmp.eq.s32.totalorder %s1033_s29, 0 }
   0x9   : > { %p191_p3 = scmp.eq.s32.totalorder %s834_s6, 1  ;;  %p196_p4 = scmp.ne.s32.totalorder %s1025_s27, %s1021_s26 }
   0xa   : > { %s1118_s11 = scalar_select %p26_p1, %s1029_s28, %s28_s9  }
   0xb   : > { %p37_p5 = por %p36_p2, %p35_p0  ;;  %p1120_p6 = por %p191_p3, %p35_p0 }
   0xc   : > { %p197_p7 = scmp.eq.s32.totalorder %s835_s30, 1  ;;  %p837_p9 = scmp.ge.s32.totalorder %s1033_s29, 2 }
   0xe   : > { %p1124_p8 = por %p197_p7, %p196_p4  ;;  %231 = sbr.rel (%p837_p9) target bundleno = 28 (0x1c), region = 40 }
  0x15   : > { %234 = sbr.rel (!%p37_p5) target bundleno = 28 (0x1c), region = 44  ;;  %s236_s14 = sand.u32 (%p37_p5), 1, %s1029_s28  }
  0x16   : > { %s873_s15 = sshll.u32 (%p37_p5), %s1033_s29, 4  ;;  %s838_s16 = sshll.u32 (%p37_p5), %s236_s14, 5 }
  0x17   : > { %s241_s19 = scalar_lea.vmem (%p37_p5), %s1264_s0, %s873_s15  ;;  %s238_s20 = scalar_lea.vmem (%p37_p5), [#allocation3], %s838_s16 }
  0x18   : > { %v254_v0 = vld [vmem:[%s241_s19] sm:$0xff] (%p37_p5)  ;;  %v256_v1 = vld [vmem:[%s241_s19 + $0x8] sm:$0xff] (%p37_p5) }
  0x19   : > { %v258_v2 = vld [vmem:[%s241_s19 + $0x20] sm:$0xff] (%p37_p5)  ;;  %255 = vst [vmem:[%s238_s20] sm:$0xff] (%p37_p5), %v254_v0  ;;  %257 = vst [vmem:[%s238_s20 + $0x8] sm:$0xff] (%p37_p5), %v256_v1  ;;  %v260_v3 = vld [vmem:[%s241_s19 + $0x28] sm:$0xff] (%p37_p5) }
  0x1a   : > { %259 = vst [vmem:[%s238_s20 + $0x10] sm:$0xff] (%p37_p5), %v258_v2  ;;  %261 = vst [vmem:[%s238_s20 + $0x18] sm:$0xff] (%p37_p5), %v260_v3 }
  0x1c PF: > { %p841_p10 = scmp.ge.s32.totalorder %s1033_s29, 1  ;;  %p266_p11 = scmp.lt.s32.totalorder %s1033_s29, 3 }
  0x1e   : > { %p267_p12 = pnand %p841_p10, %p266_p11 }
  0x1f   : > { %s1139_s21 = sand.u32 (!%p267_p12), 1, %s1025_s27   ;;  %v1035_v4 = vmov (!%p267_p12), 0.0   ;;  %v314_v5 = vld [vmem:[%s1266_s2] sm:$0xff] (!%p267_p12)  ;;  %v316_v6 = vld [vmem:[%s1266_s2 + $0x10] sm:$0xff] (!%p267_p12)  ;;  %v1036_v7 = vmov (!%p267_p12), 0   ;;  %v315_v13 = vld [vmem:[%s1266_s2 + $0x8] sm:$0xff] (!%p267_p12) }
  0x20   : > { %270 = sbr.rel (%p267_p12) target bundleno = 603 (0x25b), region = 67  ;;  %s842_s22 = sshll.u32 (!%p267_p12), %s1139_s21, 5  ;;  %415 = vmatprep.mubr.f32.mxu0 (!%p267_p12), %v1035_v4  ;;  %593 = vmatprep.mubr.f32.mxu1 (!%p267_p12), %v1035_v4  ;;  %v317_v15 = vld [vmem:[%s1266_s2 + $0x18] sm:$0xff] (!%p267_p12)  ;;  %v310_v16 = vld [vmem:[%s1265_s1] sm:$0xff] (!%p267_p12)  ;;  %vm338_vm0 = vcmask (!%p267_p12), 130048   ;;  %v493_v18 = vld [vmem:[%s1268_s4 + $0x8] sm:$0xff] (!%p267_p12) }
  0x21   : > { %929 = vset.pattern.permute.xlu0 (!%p267_p12), %v1036_v7  ;;  %930 = vset.pattern.permute.xlu1 (!%p267_p12), %v1036_v7  ;;  %s275_s9 = scalar_lea.vmem (!%p267_p12), [#allocation3], %s842_s22  ;;  %v492_v17 = vld [vmem:[%s1268_s4] sm:$0xff] (!%p267_p12)  ;;  %v311_v19 = vld [vmem:[%s1265_s1 + $0x8] sm:$0xff] (!%p267_p12)  ;;  %v494_v20 = vld [vmem:[%s1268_s4 + $0x10] sm:$0xff] (!%p267_p12)  ;;  %vm516_vm9 = vcmask (!%p267_p12), 261120   ;;  %s716_s22 = sld [smem:[#allocation2]] (!%p267_p12) }
  0x22   : > { %v307_v8 = vld [vmem:[%s275_s9 + $0x8] sm:$0xff] (!%p267_p12)  ;;  %v309_v9 = vld [vmem:[%s275_s9 + $0x18] sm:$0xff] (!%p267_p12)  ;;  %v306_v10 = vld [vmem:[%s275_s9] sm:$0xff] (!%p267_p12)  ;;  %320 = vperm.xlu0 (!%p267_p12), %929, %v314_v5   ;;  %330 = vperm.xlu1 (!%p267_p12), %930, %v316_v6   ;;  %s843_s23 = sshll.u32 (!%p267_p12), %s1139_s21, 1  ;;  %s874_s24 = sshll.u32 (!%p267_p12), %s834_s6, 5 }
  0x23   : > { %v875_v11 = vpack.c.bf16 (!%p267_p12), %v309_v9, %v307_v8  ;;  %v308_v12 = vld [vmem:[%s275_s9 + $0x10] sm:$0xff] (!%p267_p12)  ;;  %v495_v21 = vld [vmem:[%s1268_s4 + $0x18] sm:$0xff] (!%p267_p12)  ;;  %v666_v23 = vld [vmem:[%s1269_s5] sm:$0xff] (!%p267_p12)  ;;  %s303_s25 = scalar_lea.vmem (!%p267_p12), [#allocation4], %s843_s23  ;;  %s1220_s14 = scalar_lea.hbm (!%p267_p12), %s1271_s7, %s874_s24 }
  0x24   : > { %v877_v14 = vpack.c.bf16 (!%p267_p12), %v308_v12, %v306_v10  ;;  %v312_v22 = vld [vmem:[%s1265_s1 + $0x10] sm:$0xff] (!%p267_p12)  ;;  %v667_v24 = vld [vmem:[%s1269_s5 + $0x8] sm:$0xff] (!%p267_p12)  ;;  %v313_v25 = vld [vmem:[%s1265_s1 + $0x18] sm:$0xff] (!%p267_p12)  ;;  %s770_s30 = sshll.u32 (!%p267_p12), %s303_s25, 4  ;;  %s756_s15 = scalar_lea.sflag (!%p267_p12), [#allocation5], %s1139_s21  ;;  %s1222_s30 = int_to_ptr.vmem [resolvable:$true] %s770_s30 }
  0x25   : > { %876 = vmatprep.subr.bf16.mxu0 (!%p267_p12), %v875_v11  ;;  %v668_v26 = vld [vmem:[%s1269_s5 + $0x10] sm:$0xff] (!%p267_p12)  ;;  %v669_v27 = vld [vmem:[%s1269_s5 + $0x18] sm:$0xff] (!%p267_p12)  ;;  %s971_s16 = scalar_lea.vmem (!%p267_p12), %s1222_s30, 32  ;;  %s1038_s6 = smov (!%p267_p12), [#allocation4]  }
  0x26   : > { %878 = vmatpush1.bf16.msra.mxu0 (!%p267_p12), %v877_v14  ;;  %325 = vperm.xlu0 (!%p267_p12), %929, %v315_v13   ;;  %p972_p13 = scmp.ne.s32.totalorder (!%p267_p12), %s1222_s30, %s971_s16  ;;  %s975_s17 = sshll.u32 (!%p267_p12), %s1038_s6, 4  ;;  %s976_s17 = int_to_ptr.vmem [resolvable:$false] %s975_s17 }
  0x27   : > { %335 = vperm.xlu1 %930, %v317_v15   ;;  %s977_s18 = scalar_lea.vmem %s976_s17, 64  ;;  %p978_p2 = scmp.lt.s32.totalorder %s1222_s30, %s976_s17 }
  0x28   : > { %p973_p0 = pnand %p972_p13, %p1120_p6  ;;  %p979_p3 = scmp.lt.s32.totalorder %s977_s18, %s971_s16 }
  0x29   : > { %844 = vmatmul.mubr.msk.f32.vlgmr.msra.gmra.mrb[0].mxu0 %vm338_vm0, %v310_v16 }
  0x2a   : > { %421 = vmatprep.mubr.f32.mxu0 %v1035_v4  ;;  %498 = vperm.xlu0 %929, %v492_v17   ;;  %p974_p1 = pneg %p973_p0  ;;  %p980_p4 = por %p979_p3, %p978_p2 }
  0x2b   : > { %503 = vperm.xlu1 %930, %v493_v18  }
  0x2c   : > { %p981_p5 = pnand %p980_p4, %p974_p1 }
  0x2d   : > { %845 = vmatmul.mubr.msk.f32.gmra.mrb[2].mxu0 %vm338_vm0, %v311_v19 }
  0x2e   : > { %427 = vmatprep.mubr.f32.mxu0 %v1035_v4  ;;  %508 = vperm.xlu0 %929, %v494_v20  }
  0x2f   : > { %513 = vperm.xlu1 %930, %v495_v21  }
  0x31   : > { %846 = vmatmul.mubr.msk.f32.gmra.mrb[4].mxu0 %vm338_vm0, %v312_v22 }
  0x32   : > { %433 = vmatprep.mubr.f32.mxu0 %v1035_v4  ;;  %672 = vperm.xlu0 %929, %v666_v23  }
  0x33   : > { %677 = vperm.xlu1 %930, %v667_v24  }
  0x35   : > { %847 = vmatmul.mubr.msk.f32.gmra.mrb[6].mxu0 %vm338_vm0, %v313_v25 }
  0x36   : > { %682 = vperm.xlu0 %929, %v668_v26  }
  0x37   : > { %687 = vperm.xlu1 %930, %v669_v27  }
  0xa1   : > { %v321_v28 = vpop.permute.xlu0 %320  ;;  %v331_v40 = vpop.permute.xlu1 %330 }
  0xa5   : > { %v326_v34 = vpop.permute.xlu0 %325 }
  0xa6   : > { %v336_v52 = vpop.permute.xlu1 %335 }
  0xfc   : > { %v417_v29 = vpop.f32.mrb[0].mxu0 }
  0xfd   : > { %v418_v30 = vadd.f32 %v417_v29, %v321_v28  ;;  %v419_v31 = vpop.f32.mrb[1].mxu0  ;;  %v488_v29 = vld [vmem:[%s1267_s3] sm:$0xff] }
  0xfe   : > { %v420_v32 = vadd.f32 %v419_v31, %v321_v28  ;;  %v490_v31 = vld [vmem:[%s1267_s3 + $0x10] sm:$0xff] }
  0xff   : > { %v448_v33 = vmin.f32 %v418_v30, 0.0  ;;  %vm440_vm1 = vcmp.gt.f32.partialorder %v418_v30, 0.0 }
 0x100   : > { %v449_v35 = vmin.f32 %v420_v32, 0.0  ;;  %v423_v36 = vpop.f32.mrb[2].mxu0  ;;  %vm441_vm3 = vcmp.gt.f32.partialorder %v420_v32, 0.0 }
 0x101   : > { %v456_v37 = vmul.f32 1.442695, %v448_v33  ;;  %v424_v38 = vadd.f32 %v423_v36, %v326_v34  ;;  %v425_v39 = vpop.f32.mrb[3].mxu0  ;;  %v499_v33 = vpop.permute.xlu0 %498 }
 0x102   : > { %v458_v41 = vmul.f32 1.442695, %v449_v35  ;;  %v426_v42 = vadd.f32 %v425_v39, %v326_v34  ;;  %v504_v39 = vpop.permute.xlu1 %503 }
 0x103   : > { %931 = vpow2.f32 %v456_v37  ;;  %v450_v43 = vmin.f32 %v424_v38, 0.0  ;;  %vm442_vm2 = vcmp.gt.f32.partialorder %v424_v38, 0.0 }
 0x104   : > { %933 = vpow2.f32 %v458_v41  ;;  %v451_v44 = vmin.f32 %v426_v42, 0.0  ;;  %v429_v45 = vpop.f32.mrb[4].mxu0  ;;  %vm443_vm4 = vcmp.gt.f32.partialorder %v426_v42, 0.0 }
 0x105   : > { %v460_v46 = vmul.f32 1.442695, %v450_v43  ;;  %v430_v47 = vadd.f32 %v429_v45, %v331_v40  ;;  %v431_v48 = vpop.f32.mrb[5].mxu0 }
 0x106   : > { %v462_v49 = vmul.f32 1.442695, %v451_v44  ;;  %v432_v50 = vadd.f32 %v431_v48, %v331_v40 }
 0x107   : > { %935 = vpow2.f32 %v460_v46  ;;  %v452_v51 = vmin.f32 %v430_v47, 0.0  ;;  %vm444_vm5 = vcmp.gt.f32.partialorder %v430_v47, 0.0 }
 0x108   : > { %937 = vpow2.f32 %v462_v49  ;;  %v453_v53 = vmin.f32 %v432_v50, 0.0  ;;  %v435_v54 = vpop.f32.mrb[6].mxu0  ;;  %vm445_vm7 = vcmp.gt.f32.partialorder %v432_v50, 0.0 }
 0x109   : > { %v464_v55 = vmul.f32 1.442695, %v452_v51  ;;  %v436_v56 = vadd.f32 %v435_v54, %v336_v52  ;;  %v437_v57 = vpop.f32.mrb[7].mxu0 }
 0x10a   : > { %v466_v58 = vmul.f32 1.442695, %v453_v53  ;;  %v438_v59 = vadd.f32 %v437_v57, %v336_v52 }
 0x10b   : > { %939 = vpow2.f32 %v464_v55  ;;  %v454_v60 = vmin.f32 %v436_v56, 0.0  ;;  %vm446_vm6 = vcmp.gt.f32.partialorder %v436_v56, 0.0 }
 0x10c   : > { %941 = vpow2.f32 %v466_v58  ;;  %v455_v61 = vmin.f32 %v438_v59, 0.0  ;;  %vm447_vm8 = vcmp.gt.f32.partialorder %v438_v59, 0.0 }
 0x10d   : > { %v932_v62 = vpop.eup %931  ;;  %v468_v63 = vmul.f32 1.442695, %v454_v60 }
 0x10e   : > { %v934_v0 = vpop.eup %933  ;;  %v470_v1 = vmul.f32 1.442695, %v455_v61  ;;  %v848_v2 = vadd.f32 -1.0, %v932_v62 }
 0x10f   : > { %943 = vpow2.f32 %v468_v63  ;;  %v849_v5 = vadd.f32 -1.0, %v934_v0 }
 0x110   : > { %945 = vpow2.f32 %v470_v1  ;;  %v480_v9 = vsel %vm440_vm1, %v418_v30, %v848_v2  ;;  %v489_v30 = vld [vmem:[%s1267_s3 + $0x8] sm:$0xff] }
 0x111   : > { %v936_v3 = vpop.eup %935  ;;  %v481_v12 = vsel %vm441_vm3, %v420_v32, %v849_v5  ;;  %v491_v32 = vld [vmem:[%s1267_s3 + $0x18] sm:$0xff] }
 0x112   : > { %v938_v6 = vpop.eup %937  ;;  %v850_v7 = vadd.f32 -1.0, %v936_v3 }
 0x113   : > { %v851_v8 = vadd.f32 -1.0, %v938_v6 }
 0x114   : > { %v482_v10 = vsel %vm442_vm2, %v424_v38, %v850_v7 }
 0x115   : > { %v940_v11 = vpop.eup %939  ;;  %v483_v13 = vsel %vm443_vm4, %v426_v42, %v851_v8  ;;  %v881_v14 = vpack.c.bf16 %v482_v10, %v480_v9 }
 0x116   : > { %v942_v15 = vpop.eup %941  ;;  %v879_v16 = vpack.c.bf16 %v483_v13, %v481_v12  ;;  %v852_v17 = vadd.f32 -1.0, %v940_v11 }
 0x117   : > { %v853_v19 = vadd.f32 -1.0, %v942_v15 }
 0x118   : > { %880 = vmatprep.subr.bf16.mxu1 %v879_v16  ;;  %v484_v23 = vsel %vm444_vm5, %v430_v47, %v852_v17  ;;  %v509_v47 = vpop.permute.xlu0 %508 }
 0x119   : > { %v944_v18 = vpop.eup %943  ;;  %882 = vmatpush1.bf16.msra.mxu1 %v881_v14  ;;  %v485_v25 = vsel %vm445_vm7, %v432_v50, %v853_v19 }
 0x11a   : > { %v946_v20 = vpop.eup %945  ;;  %v854_v21 = vadd.f32 -1.0, %v944_v18 }
 0x11b   : > { %v855_v22 = vadd.f32 -1.0, %v946_v20 }
 0x11c   : > { %v486_v24 = vsel %vm446_vm6, %v436_v56, %v854_v21  ;;  %v514_v56 = vpop.permute.xlu1 %513  ;;  %v673_v11 = vpop.permute.xlu0 %672 }
 0x11d   : > { %v487_v26 = vsel %vm447_vm8, %v438_v59, %v855_v22  ;;  %v885_v27 = vpack.c.bf16 %v486_v24, %v484_v23 }
 0x11e   : > { %v883_v28 = vpack.c.bf16 %v487_v26, %v485_v25 }
 0x120   : > { %884 = vmatprep.subr.bf16.mxu1 %v883_v28  ;;  %v678_v16 = vpop.permute.xlu1 %677  ;;  %v683_v28 = vpop.permute.xlu0 %682 }
 0x121   : > { %886 = vmatpush1.bf16.msra.mxu1 %v885_v27 }
 0x124   : > { %856 = vmatmul.mubr.msk.f32.vlgmr.msra.gmra.mrb[0].mxu1 %vm516_vm9, %v488_v29 }
 0x125   : > { %599 = vmatprep.mubr.f32.mxu1 %v1035_v4 }
 0x128   : > { %857 = vmatmul.mubr.msk.f32.gmra.mrb[2].mxu1 %vm516_vm9, %v489_v30 }
 0x129   : > { %605 = vmatprep.mubr.f32.mxu1 %v1035_v4 }
 0x12c   : > { %858 = vmatmul.mubr.msk.f32.gmra.mrb[4].mxu1 %vm516_vm9, %v490_v31 }
 0x12d   : > { %611 = vmatprep.mubr.f32.mxu1 %v1035_v4 }
 0x130   : > { %859 = vmatmul.mubr.msk.f32.gmra.mrb[6].mxu1 %vm516_vm9, %v491_v32 }
 0x1f7   : > { %v595_v34 = vpop.f32.mrb[0].mxu1 }
 0x1f8   : > { %v596_v35 = vadd.f32 %v595_v34, %v499_v33  ;;  %v597_v36 = vpop.f32.mrb[1].mxu1 }
 0x1f9   : > { %v598_v37 = vadd.f32 %v597_v36, %v499_v33 }
 0x1fa   : > { %v626_v38 = vmin.f32 %v596_v35, 0.0  ;;  %vm618_vm10 = vcmp.gt.f32.partialorder %v596_v35, 0.0 }
 0x1fb   : > { %v627_v40 = vmin.f32 %v598_v37, 0.0  ;;  %v601_v41 = vpop.f32.mrb[2].mxu1  ;;  %vm619_vm11 = vcmp.gt.f32.partialorder %v598_v37, 0.0 }
 0x1fc   : > { %v634_v42 = vmul.f32 1.442695, %v626_v38  ;;  %v602_v43 = vadd.f32 %v601_v41, %v504_v39  ;;  %v603_v44 = vpop.f32.mrb[3].mxu1 }
 0x1fd   : > { %v636_v45 = vmul.f32 1.442695, %v627_v40  ;;  %v604_v46 = vadd.f32 %v603_v44, %v504_v39  ;;  %v688_v39 = vpop.permute.xlu1 %687 }
 0x1fe   : > { %947 = vpow2.f32 %v634_v42  ;;  %v628_v4 = vmin.f32 %v602_v43, 0.0  ;;  %vm620_vm12 = vcmp.gt.f32.partialorder %v602_v43, 0.0 }
 0x1ff   : > { %949 = vpow2.f32 %v636_v45  ;;  %v629_v48 = vmin.f32 %v604_v46, 0.0  ;;  %v607_v49 = vpop.f32.mrb[4].mxu1  ;;  %vm621_vm13 = vcmp.gt.f32.partialorder %v604_v46, 0.0 }
 0x200   : > { %v638_v50 = vmul.f32 1.442695, %v628_v4  ;;  %v608_v51 = vadd.f32 %v607_v49, %v509_v47  ;;  %v609_v52 = vpop.f32.mrb[5].mxu1 }
 0x201   : > { %v640_v53 = vmul.f32 1.442695, %v629_v48  ;;  %v610_v54 = vadd.f32 %v609_v52, %v509_v47 }
 0x202   : > { %951 = vpow2.f32 %v638_v50  ;;  %v630_v55 = vmin.f32 %v608_v51, 0.0  ;;  %vm622_vm14 = vcmp.gt.f32.partialorder %v608_v51, 0.0 }
 0x203   : > { %953 = vpow2.f32 %v640_v53  ;;  %v631_v57 = vmin.f32 %v610_v54, 0.0  ;;  %v613_v58 = vpop.f32.mrb[6].mxu1  ;;  %vm623_vm15 = vcmp.gt.f32.partialorder %v610_v54, 0.0 }
 0x204   : > { %v642_v59 = vmul.f32 1.442695, %v630_v55  ;;  %v614_v60 = vadd.f32 %v613_v58, %v514_v56  ;;  %v615_v61 = vpop.f32.mrb[7].mxu1  ;;  %v717_v55 = vstv %s716_s22 }
 0x205   : > { %v644_v62 = vmul.f32 1.442695, %v631_v57  ;;  %v616_v63 = vadd.f32 %v615_v61, %v514_v56 }
 0x206   : > { %955 = vpow2.f32 %v642_v59  ;;  %v632_v0 = vmin.f32 %v614_v60, 0.0  ;;  %vm624_vm0 = vcmp.gt.f32.partialorder %v614_v60, 0.0 }
 0x207   : > { %957 = vpow2.f32 %v644_v62  ;;  %v633_v1 = vmin.f32 %v616_v63, 0.0  ;;  %vm625_vm1 = vcmp.gt.f32.partialorder %v616_v63, 0.0 }
 0x208   : > { %v948_v2 = vpop.eup %947  ;;  %v646_v3 = vmul.f32 1.442695, %v632_v0 }
 0x209   : > { %v950_v5 = vpop.eup %949  ;;  %v860_v6 = vadd.f32 -1.0, %v948_v2  ;;  %v648_v7 = vmul.f32 1.442695, %v633_v1 }
 0x20a   : > { %v861_v8 = vadd.f32 -1.0, %v950_v5  ;;  %959 = vpow2.f32 %v646_v3 }
 0x20b   : > { %961 = vpow2.f32 %v648_v7  ;;  %v658_v12 = vsel %vm618_vm10, %v596_v35, %v860_v6  ;;  %v1037_v6 = vmov 1966171168  }
 0x20c   : > { %v952_v9 = vpop.eup %951  ;;  %v659_v14 = vsel %vm619_vm11, %v598_v37, %v861_v8  ;;  %v690_v19 = vmul.f32 %v673_v11, %v658_v12  ;;  %v736_v7 = vunpack.c.l.s4 %v1037_v6  ;;  %v738_v8 = vlaneseq }
 0x20d   : > { %v954_v10 = vpop.eup %953  ;;  %v862_v13 = vadd.f32 -1.0, %v952_v9  ;;  %v691_v23 = vmul.f32 %v673_v11, %v659_v14 }
 0x20e   : > { %v863_v15 = vadd.f32 -1.0, %v954_v10  ;;  %v737_v9 = vunpack.c.0.s8 %v736_v7  ;;  %v739_v10 = vshrl.u32 %v738_v8, 7  ;;  %vm752_vm2 = vcmp.lt.s32.totalorder %v738_v8, 256 }
 0x20f   : > { %v660_v17 = vsel %vm620_vm12, %v602_v43, %v862_v13 }
 0x210   : > { %v956_v18 = vpop.eup %955  ;;  %v692_v20 = vmul.f32 %v678_v16, %v660_v17  ;;  %v661_v21 = vsel %vm621_vm13, %v604_v46, %v863_v15  ;;  %v740_v12 = vsub.s32 %v737_v9, %v739_v10 }
 0x211   : > { %v958_v22 = vpop.eup %957  ;;  %v693_v24 = vmul.f32 %v678_v16, %v661_v21  ;;  %v864_v25 = vadd.f32 -1.0, %v956_v18 }
 0x212   : > { %v698_v26 = vadd.f32 %v692_v20, %v690_v19  ;;  %v865_v27 = vadd.f32 -1.0, %v958_v22 }
 0x213   : > { %v707_v29 = vadd.f32 %v693_v24, %v691_v23  ;;  %v662_v30 = vsel %vm622_vm14, %v608_v51, %v864_v25 }
 0x214   : > { %v960_v31 = vpop.eup %959  ;;  %v694_v32 = vmul.f32 %v683_v28, %v662_v30  ;;  %v663_v33 = vsel %vm623_vm15, %v610_v54, %v865_v27 }
 0x215   : > { %v962_v34 = vpop.eup %961  ;;  %v695_v35 = vmul.f32 %v683_v28, %v663_v33  ;;  %v866_v36 = vadd.f32 -1.0, %v960_v31 }
 0x216   : > { %v699_v37 = vadd.f32 %v698_v26, %v694_v32  ;;  %v867_v38 = vadd.f32 -1.0, %v962_v34 }
 0x217   : > { %v708_v40 = vadd.f32 %v707_v29, %v695_v35  ;;  %v664_v41 = vsel %vm624_vm0, %v614_v60, %v866_v36 }
 0x218   : > { %v696_v42 = vmul.f32 %v688_v39, %v664_v41  ;;  %v665_v43 = vsel %vm625_vm1, %v616_v63, %v867_v38 }
 0x219   : > { %v697_v44 = vmul.f32 %v688_v39, %v665_v43 }
 0x21a   : > { %v700_v45 = vadd.f32 %v699_v37, %v696_v42 }
 0x21b   : > { %v709_v46 = vadd.f32 %v708_v40, %v697_v44 }
 0x21c   : > { %v701_v4 = vrot.slane %v700_v45, 4 }
 0x21d   : > { %v710_v47 = vrot.slane %v709_v46, 4 }
 0x21e   : > { %v702_v48 = vadd.f32 %v701_v4, %v700_v45 }
 0x21f   : > { %v711_v49 = vadd.f32 %v710_v47, %v709_v46 }
 0x220   : > { %v703_v50 = vrot.slane %v702_v48, 2 }
 0x221   : > { %v712_v51 = vrot.slane %v711_v49, 2 }
 0x222   : > { %v704_v52 = vadd.f32 %v703_v50, %v702_v48 }
 0x223   : > { %v713_v53 = vadd.f32 %v712_v51, %v711_v49 }
 0x224   : > { %v705_v54 = vrot.slane %v704_v52, 1 }
 0x225   : > { %v714_v56 = vrot.slane %v713_v53, 1 }
 0x226   : > { %v706_v57 = vadd.f32 %v705_v54, %v704_v52 }
 0x227   : > { %v715_v58 = vadd.f32 %v714_v56, %v713_v53 }
 0x228   : > { %v718_v59 = vadd.f32 %v717_v55, %v706_v57 }
 0x229   : > { %v719_v60 = vadd.f32 %v717_v55, %v715_v58 }
 0x22a   : > { %v720_v61 = vsub.f32 0.0, %v718_v59 }
 0x22b   : > { %v721_v62 = vsub.f32 0.0, %v719_v60 }
 0x22c   : > { %v722_v63 = vmul.f32 1.442695, %v720_v61 }
 0x22d   : > { %v724_v0 = vmul.f32 1.442695, %v721_v62 }
 0x22e   : > { %963 = vpow2.f32 %v722_v63 }
 0x22f   : > { %965 = vpow2.f32 %v724_v0 }
 0x238   : > { %v964_v1 = vpop.eup %963 }
 0x239   : > { %v966_v2 = vpop.eup %965  ;;  %v726_v3 = vadd.f32 1.0, %v964_v1 }
 0x23a   : > { %v727_v5 = vadd.f32 1.0, %v966_v2 }
 0x23b   : > { %967 = vrcp.f32 %v726_v3 }
 0x23c   : > { %969 = vrcp.f32 %v727_v5 }
 0x245   : > { %v968_v11 = vpop.eup %967 }
 0x246   : > { %v970_v13 = vpop.eup %969 }
 0x247   : > { %v734_v14 = vcombine.low %v968_v11, %v970_v13 }
 0x249   : > { %v741_v15 = vrot.slane %v734_v14, %v740_v12 }
 0x24b   : > { %v748_v16 = vrot.slane %v741_v15, %v740_v12 }
 0x24d   : > { %754 = vst.msk [vmem:[%s303_s25] sm:$0x3] %vm752_vm2, %v748_v16 }
 0x24e   : > { %984 = shalt.err (!%p981_p5)
}
 0x24f   : > { %s985_s21 = scalar_lea.hbm %s1220_s14, 32  ;;  %s989_s22 = scalar_lea.hbm %s1271_s7, 64 }
 0x250   : > { %p986_p7 = scmp.ne.s32.totalorder %s1220_s14, %s985_s21  ;;  %p990_p12 = scmp.lt.u32.totalorder %s1220_s14, %s1271_s7 }
 0x251   : > { %p991_p13 = scmp.lt.u32.totalorder %s989_s22, %s985_s21  ;;  %p993_p1 = scmp.lt.u32.totalorder %s985_s21, %s1220_s14 }
 0x252   : > { %p987_p10 = pnand %p986_p7, %p1120_p6 }
 0x253   : > { %p992_p0 = por %p991_p13, %p990_p12 }
 0x254   : > { %p988_p11 = pneg %p987_p10 }
 0x255   : > { %p994_p2 = por %p993_p1, %p992_p0 }
 0x257   : > { %p995_p3 = pnand %p994_p2, %p988_p11 }
 0x259   : > { %998 = shalt.err (!%p995_p3)
}
 0x25a   : > { %887 = dma.vmem_to_hbm [thread:$0]  (%p1120_p6), %s1222_s30, 32, %s1220_s14, %s756_s15  }
 0x25b PF: > { %s782_s25 = sand.u32 1, %s1021_s26   ;;  %p890_p4 = pnand %p837_p9, %p1124_p8 }
 0x25c   : > { %s783_s9 = scalar_lea.sflag [#allocation5], %s782_s25 }
 0x25d   : > { %1016 = dma.done.wait (!%p890_p4), %s783_s9, 32  }
 0x25e   : > { %1018 = vsyncadd (!%p890_p4), %s783_s9, 4294967264  ;;  %p18_p5 = scmp.ge.s32.totalorder %s1105_s8, 4   ;;  %s1274_s26 = smov %s1025_s27 }
 0x25f   : > { %s1275_s27 = smov %s1029_s28  ;;  %s1276_s28 = smov %s1118_s11 }
 0x260   : > { %s1277_s29 = smov %s1105_s8  ;;  %20 = sbr.rel (!%p18_p5) target bundleno = 5 (0x5), region = 111 }
 0x267   :  { %788 = vsyncpa [#allocation5], 1 }
 0x268   :  { %790 = vsyncpa [#allocation5 + $0x1], 1 }

</bundles_post_ra>
